<compile_context>
chip_gen: v7x
topology: tpu7x:2x2x1
jax: 0.10.0
libtpu: 0.0.40
codegen_flags: <defaults>
</compile_context>

<pallas_src>
import jax
import jax.numpy as jnp
from jax.experimental import pallas as pl
from jax.experimental.pallas import tpu as pltpu


# ---------------------------------------------------------------------------
# Phase 1: fused QKV projection, written head-major (B, H, S, d) directly.
# Grid = (batch, head); each step is a plain (S, d_model) x (d_model, d_head)
# MXU matmul per projection.  Weights are passed pre-split as (H, d_model, d)
# so every block's trailing dims equal full array dims (no (8,128) violations
# and no narrow lane slices anywhere).
# ---------------------------------------------------------------------------

def _make_qkv_kernel(op_dtype):
    def kernel(xq_ref, xk_ref, xv_ref, wq_ref, wk_ref, wv_ref,
               qo_ref, ko_ref, vo_ref):
        def proj(x_ref, w_ref):
            return jnp.dot(x_ref[0].astype(op_dtype), w_ref[0],
                           preferred_element_type=jnp.float32)
        qo_ref[0, 0] = proj(xq_ref, wq_ref).astype(qo_ref.dtype)
        ko_ref[0, 0] = proj(xk_ref, wk_ref).astype(ko_ref.dtype)
        vo_ref[0, 0] = proj(xv_ref, wv_ref).astype(vo_ref.dtype)
    return kernel


def _qkv_project(q, k, v, wq3, wk3, wv3, *, n_head, d_k, d_v, op_dtype):
    sz_b, len_q, d_model = q.shape
    _, len_k, _ = k.shape
    # TODO(synk): tile the sequence dim for very long S (full-S blocks here).
    return pl.pallas_call(
        _make_qkv_kernel(op_dtype),
        out_shape=(
            jax.ShapeDtypeStruct((sz_b, n_head, len_q, d_k), op_dtype),
            jax.ShapeDtypeStruct((sz_b, n_head, len_k, d_k), op_dtype),
            jax.ShapeDtypeStruct((sz_b, n_head, len_k, d_v), op_dtype),
        ),
        grid=(sz_b, n_head),            # head innermost: x blocks reused across it
        in_specs=[
            pl.BlockSpec((1, len_q, d_model), lambda b, h: (b, 0, 0)),
            pl.BlockSpec((1, len_k, d_model), lambda b, h: (b, 0, 0)),
            pl.BlockSpec((1, len_k, d_model), lambda b, h: (b, 0, 0)),
            pl.BlockSpec((1, d_model, d_k), lambda b, h: (h, 0, 0)),
            pl.BlockSpec((1, d_model, d_k), lambda b, h: (h, 0, 0)),
            pl.BlockSpec((1, d_model, d_v), lambda b, h: (h, 0, 0)),
        ],
        out_specs=(
            pl.BlockSpec((1, 1, len_q, d_k), lambda b, h: (b, h, 0, 0)),
            pl.BlockSpec((1, 1, len_k, d_k), lambda b, h: (b, h, 0, 0)),
            pl.BlockSpec((1, 1, len_k, d_v), lambda b, h: (b, h, 0, 0)),
        ),
        compiler_params=pltpu.CompilerParams(
            dimension_semantics=("parallel", "parallel")),
    )(q, k, v, wq3, wk3, wv3)


# ---------------------------------------------------------------------------
# Phase 2: attention + output projection + residual + LayerNorm.
# Grid = (batch, q-tiles), both parallel.  K/V blocks are constant across the
# inner q-tile dim; fc weight / gamma / beta are constant across the whole grid
# and single-buffered.
# ---------------------------------------------------------------------------

def _pick_q_tile(lq, pref=256):
    """Largest q-tile <= pref (multiple of 8) that divides len_q, else full."""
    if lq <= pref:
        return lq
    for t in range(pref, 7, -8):
        if lq % t == 0:
            return t
    return lq   # awkward len_q: single full-length tile (fine for small demos)


def _make_attn_kernel(inv_temp, op_dtype, with_attn, eps=1e-6):
    def body(qp_ref, kp_ref, vp_ref, res_ref, wo_ref, g_ref, b_ref,
             out_ref, attn_ref):
        # Head-major blocks: (H, tq, dk) / (H, Lk, dk) / (H, Lk, dv).
        qh = (qp_ref[0].astype(jnp.float32) * inv_temp).astype(op_dtype)
        kh = kp_ref[0]
        vh = vp_ref[0]

        # Head-batched QK^T contracting the last dims (no transpose materialized).
        s = jnp.einsum('hqd,hkd->hqk', qh, kh,
                       preferred_element_type=jnp.float32)      # (H, tq, Lk)

        # TODO(synk): attention-mask support (module exercised with mask=None);
        # attention dropout (p=0.1) + output dropout run in eval mode -> identity.
        # TODO(synk): flash-style Lk tiling when return_attn=False and S is large
        # (full-scores residency is required while the attention map is returned).

        # Stable softmax; denominator reciprocal on the EUP slot + one Newton
        # step to keep full f32 accuracy.
        m = jnp.max(s, axis=-1, keepdims=True)
        e = jnp.exp(s - m)
        denom = jnp.sum(e, axis=-1, keepdims=True)
        r = pl.reciprocal(denom, approx=True)
        r = r * (2.0 - denom * r)
        a = e * r
        if with_attn:
            attn_ref[0] = a.astype(attn_ref.dtype)

        # Head-batched attention-weighted values.
        ctx = jnp.einsum('hqk,hkd->hqd', a.astype(op_dtype), vh,
                         preferred_element_type=jnp.float32)    # (H, tq, dv)

        # Output projection: one batched contraction + cheap leading-axis sum
        # over heads (no per-head Python loop / serialized accumulation chain).
        proj = jnp.einsum('hqd,hdm->hqm', ctx.astype(op_dtype), wo_ref[...],
                          preferred_element_type=jnp.float32)   # (H, tq, d_model)
        out = res_ref[0].astype(jnp.float32) + jnp.sum(proj, axis=0)

        # LayerNorm(eps=1e-6).
        mean = jnp.mean(out, axis=-1, keepdims=True)
        cent = out - mean
        var = jnp.mean(cent * cent, axis=-1, keepdims=True)
        normed = cent * jax.lax.rsqrt(var + eps)
        out_ref[0] = (normed * g_ref[...] + b_ref[...]).astype(out_ref.dtype)

    if with_attn:
        return body

    def body_no_attn(qp_ref, kp_ref, vp_ref, res_ref, wo_ref, g_ref, b_ref,
                     out_ref):
        return body(qp_ref, kp_ref, vp_ref, res_ref, wo_ref, g_ref, b_ref,
                    out_ref, None)

    return body_no_attn


def multi_head_attention(q, k, v, wq, wk, wv, wo, gamma, beta, *,
                         n_head, d_k, d_v, return_attn=True,
                         operand_dtype=jnp.float32):
    sz_b, len_q, d_model = q.shape
    sz_t, len_k, _ = k.shape
    assert sz_b == sz_t, "kernel assumes matching q / kv batch"
    assert v.shape[1] == len_k, "kernel assumes len_k == len_v"
    inv_temp = 1.0 / (float(d_k) ** 0.5)
    op_dtype = jnp.dtype(operand_dtype)

    # Weight layout plumbing (cheap; in a real module these are stored pre-split).
    wq3 = wq.reshape(d_model, n_head, d_k).transpose(1, 0, 2).astype(op_dtype)
    wk3 = wk.reshape(d_model, n_head, d_k).transpose(1, 0, 2).astype(op_dtype)
    wv3 = wv.reshape(d_model, n_head, d_v).transpose(1, 0, 2).astype(op_dtype)
    wo3 = wo.reshape(n_head, d_v, d_model).astype(op_dtype)
    gamma2 = gamma.reshape(1, d_model).astype(jnp.float32)
    beta2 = beta.reshape(1, d_model).astype(jnp.float32)

    # --- Phase 1: fused QKV projection, head-major output, one launch --------
    qph, kph, vph = _qkv_project(q, k, v, wq3, wk3, wv3, n_head=n_head,
                                 d_k=d_k, d_v=d_v, op_dtype=op_dtype)

    # --- Phase 2: attention + output proj + residual + LayerNorm -------------
    tq = _pick_q_tile(len_q)
    n_qt = len_q // tq
    kernel = _make_attn_kernel(inv_temp, op_dtype, return_attn)

    def call(single_buffer_consts):
        const_kw = ({"pipeline_mode": pl.Buffered(1)}
                    if single_buffer_consts else {})
        in_specs = [
            pl.BlockSpec((1, n_head, tq, d_k), lambda b, qi: (b, 0, qi, 0)),
            pl.BlockSpec((1, n_head, len_k, d_k), lambda b, qi: (b, 0, 0, 0)),
            pl.BlockSpec((1, n_head, len_k, d_v), lambda b, qi: (b, 0, 0, 0)),
            pl.BlockSpec((1, tq, d_model), lambda b, qi: (b, qi, 0)),     # residual
            pl.BlockSpec((n_head, d_v, d_model), lambda b, qi: (0, 0, 0),
                         **const_kw),                                     # fc weight
            pl.BlockSpec((1, d_model), lambda b, qi: (0, 0), **const_kw), # ln gamma
            pl.BlockSpec((1, d_model), lambda b, qi: (0, 0), **const_kw), # ln beta
        ]
        if return_attn:
            out_shape = (
                jax.ShapeDtypeStruct((sz_b, len_q, d_model), q.dtype),
                jax.ShapeDtypeStruct((sz_b, n_head, len_q, len_k), jnp.float32),
            )
            out_specs = (
                pl.BlockSpec((1, tq, d_model), lambda b, qi: (b, qi, 0)),
                pl.BlockSpec((1, n_head, tq, len_k), lambda b, qi: (b, 0, qi, 0)),
            )
        else:
            out_shape = jax.ShapeDtypeStruct((sz_b, len_q, d_model), q.dtype)
            out_specs = pl.BlockSpec((1, tq, d_model), lambda b, qi: (b, qi, 0))
        return pl.pallas_call(
            kernel,
            out_shape=out_shape,
            grid=(sz_b, n_qt),
            in_specs=in_specs,
            out_specs=out_specs,
            compiler_params=pltpu.CompilerParams(
                dimension_semantics=("parallel", "parallel")),
        )(qph, kph, vph, q, wo3, gamma2, beta2)

    try:
        return call(True)
    except Exception:
        # Fallback if this Pallas build rejects Buffered(1) single-buffering.
        return call(False)


# ---------------------------------------------------------------------------
# Pure-JAX reference matching the PyTorch forward (eval mode, mask=None).
# ---------------------------------------------------------------------------

def ref_mha(q, k, v, wq, wk, wv, wo, gamma, beta, *, n_head, d_k, d_v):
    sz_b, len_q, d_model = q.shape
    temperature = float(d_k) ** 0.5
    qp = (q @ wq).reshape(sz_b, len_q, n_head, d_k).transpose(0, 2, 1, 3)
    kp = (k @ wk).reshape(sz_b, -1, n_head, d_k).transpose(0, 2, 1, 3)
    vp = (v @ wv).reshape(sz_b, -1, n_head, d_v).transpose(0, 2, 1, 3)
    scores = jnp.einsum('bhqd,bhkd->bhqk', qp / temperature, kp)
    attn = jax.nn.softmax(scores, axis=-1)
    ctx = jnp.einsum('bhqk,bhkd->bhqd', attn, vp)
    ctx = ctx.transpose(0, 2, 1, 3).reshape(sz_b, len_q, n_head * d_v)
    out = ctx @ wo + q
    mean = out.mean(-1, keepdims=True)
    var = ((out - mean) ** 2).mean(-1, keepdims=True)
    out = (out - mean) / jnp.sqrt(var + 1e-6) * gamma + beta
    return out, attn


if __name__ == "__main__":
    # Module hyperparameters (small, consistent with the forward).
    sz_b, seq, d_model = 2, 8, 32
    n_head, d_k, d_v = 4, 8, 8

    key = jax.random.PRNGKey(0)
    ks = jax.random.split(key, 7)
    q = jax.random.normal(ks[0], (sz_b, seq, d_model), jnp.float32)
    k = jax.random.normal(ks[1], (sz_b, seq, d_model), jnp.float32)
    v = jax.random.normal(ks[2], (sz_b, seq, d_model), jnp.float32)

    scale = 1.0 / (d_model ** 0.5)
    wq = jax.random.normal(ks[3], (d_model, n_head * d_k), jnp.float32) * scale
    wk = jax.random.normal(ks[4], (d_model, n_head * d_k), jnp.float32) * scale
    wv = jax.random.normal(ks[5], (d_model, n_head * d_v), jnp.float32) * scale
    wo = jax.random.normal(ks[6], (n_head * d_v, d_model), jnp.float32) * scale
    gamma = jnp.ones((d_model,), jnp.float32)   # nn.LayerNorm default weight
    beta = jnp.zeros((d_model,), jnp.float32)   # nn.LayerNorm default bias

    out, attn = multi_head_attention(q, k, v, wq, wk, wv, wo, gamma, beta,
                                     n_head=n_head, d_k=d_k, d_v=d_v,
                                     return_attn=True)
    jax.block_until_ready((out, attn))

    out_ref, attn_ref = ref_mha(q, k, v, wq, wk, wv, wo, gamma, beta,
                                n_head=n_head, d_k=d_k, d_v=d_v)
    assert jnp.allclose(out, out_ref, atol=1e-4, rtol=1e-4), "output mismatch"
    assert jnp.allclose(attn, attn_ref, atol=1e-4, rtol=1e-4), "attn mismatch"

    # Hot path without the O(H*S^2) attention writeback.
    out2 = multi_head_attention(q, k, v, wq, wk, wv, wo, gamma, beta,
                                n_head=n_head, d_k=d_k, d_v=d_v,
                                return_attn=False)
    jax.block_until_ready(out2)
    assert jnp.allclose(out2, out_ref, atol=1e-4, rtol=1e-4), "no-attn mismatch"

    print("KERNEL_OK")
</pallas_src>

<mosaic_0001>
module attributes {stable_mosaic.version = 11 : i64} {
  func.func @kernel(%arg0: i32, %arg1: i32, %arg2: memref<1x8x32xf32, #tpu.memory_space<vmem>>, %arg3: memref<1x8x32xf32, #tpu.memory_space<vmem>>, %arg4: memref<1x8x32xf32, #tpu.memory_space<vmem>>, %arg5: memref<1x32x8xf32, #tpu.memory_space<vmem>>, %arg6: memref<1x32x8xf32, #tpu.memory_space<vmem>>, %arg7: memref<1x32x8xf32, #tpu.memory_space<vmem>>, %arg8: memref<1x1x8x8xf32, #tpu.memory_space<vmem>>, %arg9: memref<1x1x8x8xf32, #tpu.memory_space<vmem>>, %arg10: memref<1x1x8x8xf32, #tpu.memory_space<vmem>>) attributes {dimension_semantics = [#tpu.dimension_semantics<parallel>, #tpu.dimension_semantics<parallel>], iteration_bounds = array<i64: 2, 4>, scalar_prefetch = 0 : i64, scratch_operands = 0 : i64, tpu.core_type = #tpu.core_type<tc>, window_params = [{transform_indices = @transform_0, window_bounds = array<i64: 1, 8, 32>}, {transform_indices = @transform_1, window_bounds = array<i64: 1, 8, 32>}, {transform_indices = @transform_2, window_bounds = array<i64: 1, 8, 32>}, {transform_indices = @transform_3, window_bounds = array<i64: 1, 32, 8>}, {transform_indices = @transform_4, window_bounds = array<i64: 1, 32, 8>}, {transform_indices = @transform_5, window_bounds = array<i64: 1, 32, 8>}, {transform_indices = @transform_6, window_bounds = array<i64: 1, 1, 8, 8>}, {transform_indices = @transform_7, window_bounds = array<i64: 1, 1, 8, 8>}, {transform_indices = @transform_8, window_bounds = array<i64: 1, 1, 8, 8>}]} {
    %c0 = arith.constant 0 : index
    %c0_0 = arith.constant 0 : index
    %c0_1 = arith.constant 0 : index
    %0 = vector.load %arg2[%c0, %c0_0, %c0_1] : memref<1x8x32xf32, #tpu.memory_space<vmem>>, vector<1x8x32xf32>
    %1 = vector.shape_cast %0 : vector<1x8x32xf32> to vector<8x32xf32>
    %c0_2 = arith.constant 0 : index
    %c0_3 = arith.constant 0 : index
    %c0_4 = arith.constant 0 : index
    %2 = vector.load %arg5[%c0_2, %c0_3, %c0_4] : memref<1x32x8xf32, #tpu.memory_space<vmem>>, vector<1x32x8xf32>
    %3 = vector.shape_cast %2 : vector<1x32x8xf32> to vector<32x8xf32>
    %cst = arith.constant dense<0.000000e+00> : vector<8x8xf32>
    %4 = tpu.matmul %1, %3, %cst {dimension_numbers = #tpu.dot_dimension_numbers<[1], [0], [0], [1], [0, 0, 1, 1], [], []>} : vector<8x32xf32>, vector<32x8xf32>, vector<8x8xf32> -> vector<8x8xf32>
    %c0_5 = arith.constant 0 : index
    %c0_6 = arith.constant 0 : index
    %c0_7 = arith.constant 0 : index
    %c0_8 = arith.constant 0 : index
    %5 = vector.load %arg8[%c0_5, %c0_6, %c0_7, %c0_8] : memref<1x1x8x8xf32, #tpu.memory_space<vmem>>, vector<1x1x8x8xf32>
    %6 = vector.shape_cast %5 : vector<1x1x8x8xf32> to vector<8x8xf32>
    %7 = vector.shape_cast %4 : vector<8x8xf32> to vector<1x1x8x8xf32>
    tpu.vector_store %arg8[%c0_5, %c0_6, %c0_7, %c0_8], %7 {strides = array<i32>} : memref<1x1x8x8xf32, #tpu.memory_space<vmem>>, vector<1x1x8x8xf32>,
    %c0_9 = arith.constant 0 : index
    %c0_10 = arith.constant 0 : index
    %c0_11 = arith.constant 0 : index
    %8 = vector.load %arg3[%c0_9, %c0_10, %c0_11] : memref<1x8x32xf32, #tpu.memory_space<vmem>>, vector<1x8x32xf32>
    %9 = vector.shape_cast %8 : vector<1x8x32xf32> to vector<8x32xf32>
    %c0_12 = arith.constant 0 : index
    %c0_13 = arith.constant 0 : index
    %c0_14 = arith.constant 0 : index
    %10 = vector.load %arg6[%c0_12, %c0_13, %c0_14] : memref<1x32x8xf32, #tpu.memory_space<vmem>>, vector<1x32x8xf32>
    %11 = vector.shape_cast %10 : vector<1x32x8xf32> to vector<32x8xf32>
    %cst_15 = arith.constant dense<0.000000e+00> : vector<8x8xf32>
    %12 = tpu.matmul %9, %11, %cst_15 {dimension_numbers = #tpu.dot_dimension_numbers<[1], [0], [0], [1], [0, 0, 1, 1], [], []>} : vector<8x32xf32>, vector<32x8xf32>, vector<8x8xf32> -> vector<8x8xf32>
    %c0_16 = arith.constant 0 : index
    %c0_17 = arith.constant 0 : index
    %c0_18 = arith.constant 0 : index
    %c0_19 = arith.constant 0 : index
    %13 = vector.load %arg9[%c0_16, %c0_17, %c0_18, %c0_19] : memref<1x1x8x8xf32, #tpu.memory_space<vmem>>, vector<1x1x8x8xf32>
    %14 = vector.shape_cast %13 : vector<1x1x8x8xf32> to vector<8x8xf32>
    %15 = vector.shape_cast %12 : vector<8x8xf32> to vector<1x1x8x8xf32>
    tpu.vector_store %arg9[%c0_16, %c0_17, %c0_18, %c0_19], %15 {strides = array<i32>} : memref<1x1x8x8xf32, #tpu.memory_space<vmem>>, vector<1x1x8x8xf32>,
    %c0_20 = arith.constant 0 : index
    %c0_21 = arith.constant 0 : index
    %c0_22 = arith.constant 0 : index
    %16 = vector.load %arg4[%c0_20, %c0_21, %c0_22] : memref<1x8x32xf32, #tpu.memory_space<vmem>>, vector<1x8x32xf32>
    %17 = vector.shape_cast %16 : vector<1x8x32xf32> to vector<8x32xf32>
    %c0_23 = arith.constant 0 : index
    %c0_24 = arith.constant 0 : index
    %c0_25 = arith.constant 0 : index
    %18 = vector.load %arg7[%c0_23, %c0_24, %c0_25] : memref<1x32x8xf32, #tpu.memory_space<vmem>>, vector<1x32x8xf32>
    %19 = vector.shape_cast %18 : vector<1x32x8xf32> to vector<32x8xf32>
    %cst_26 = arith.constant dense<0.000000e+00> : vector<8x8xf32>
    %20 = tpu.matmul %17, %19, %cst_26 {dimension_numbers = #tpu.dot_dimension_numbers<[1], [0], [0], [1], [0, 0, 1, 1], [], []>} : vector<8x32xf32>, vector<32x8xf32>, vector<8x8xf32> -> vector<8x8xf32>
    %c0_27 = arith.constant 0 : index
    %c0_28 = arith.constant 0 : index
    %c0_29 = arith.constant 0 : index
    %c0_30 = arith.constant 0 : index
    %21 = vector.load %arg10[%c0_27, %c0_28, %c0_29, %c0_30] : memref<1x1x8x8xf32, #tpu.memory_space<vmem>>, vector<1x1x8x8xf32>
    %22 = vector.shape_cast %21 : vector<1x1x8x8xf32> to vector<8x8xf32>
    %23 = vector.shape_cast %20 : vector<8x8xf32> to vector<1x1x8x8xf32>
    tpu.vector_store %arg10[%c0_27, %c0_28, %c0_29, %c0_30], %23 {strides = array<i32>} : memref<1x1x8x8xf32, #tpu.memory_space<vmem>>, vector<1x1x8x8xf32>,
    return
  }
  func.func @transform_0(%arg0: i32, %arg1: i32) -> (i32, i32, i32) {
    %c0_i32 = arith.constant 0 : i32
    %c0_i32_0 = arith.constant 0 : i32
    %c0_i32_1 = arith.constant 0 : i32
    return %arg0, %c0_i32, %c0_i32_0 : i32, i32, i32
  }
  func.func @transform_1(%arg0: i32, %arg1: i32) -> (i32, i32, i32) {
    %c0_i32 = arith.constant 0 : i32
    %c0_i32_0 = arith.constant 0 : i32
    %c0_i32_1 = arith.constant 0 : i32
    return %arg0, %c0_i32, %c0_i32_0 : i32, i32, i32
  }
  func.func @transform_2(%arg0: i32, %arg1: i32) -> (i32, i32, i32) {
    %c0_i32 = arith.constant 0 : i32
    %c0_i32_0 = arith.constant 0 : i32
    %c0_i32_1 = arith.constant 0 : i32
    return %arg0, %c0_i32, %c0_i32_0 : i32, i32, i32
  }
  func.func @transform_3(%arg0: i32, %arg1: i32) -> (i32, i32, i32) {
    %c0_i32 = arith.constant 0 : i32
    %c0_i32_0 = arith.constant 0 : i32
    %c0_i32_1 = arith.constant 0 : i32
    return %arg1, %c0_i32, %c0_i32_0 : i32, i32, i32
  }
  func.func @transform_4(%arg0: i32, %arg1: i32) -> (i32, i32, i32) {
    %c0_i32 = arith.constant 0 : i32
    %c0_i32_0 = arith.constant 0 : i32
    %c0_i32_1 = arith.constant 0 : i32
    return %arg1, %c0_i32, %c0_i32_0 : i32, i32, i32
  }
  func.func @transform_5(%arg0: i32, %arg1: i32) -> (i32, i32, i32) {
    %c0_i32 = arith.constant 0 : i32
    %c0_i32_0 = arith.constant 0 : i32
    %c0_i32_1 = arith.constant 0 : i32
    return %arg1, %c0_i32, %c0_i32_0 : i32, i32, i32
  }
  func.func @transform_6(%arg0: i32, %arg1: i32) -> (i32, i32, i32, i32) {
    %c0_i32 = arith.constant 0 : i32
    %c0_i32_0 = arith.constant 0 : i32
    %c0_i32_1 = arith.constant 0 : i32
    return %arg0, %arg1, %c0_i32, %c0_i32_0 : i32, i32, i32, i32
  }
  func.func @transform_7(%arg0: i32, %arg1: i32) -> (i32, i32, i32, i32) {
    %c0_i32 = arith.constant 0 : i32
    %c0_i32_0 = arith.constant 0 : i32
    %c0_i32_1 = arith.constant 0 : i32
    return %arg0, %arg1, %c0_i32, %c0_i32_0 : i32, i32, i32, i32
  }
  func.func @transform_8(%arg0: i32, %arg1: i32) -> (i32, i32, i32, i32) {
    %c0_i32 = arith.constant 0 : i32
    %c0_i32_0 = arith.constant 0 : i32
    %c0_i32_1 = arith.constant 0 : i32
    return %arg0, %arg1, %c0_i32, %c0_i32_0 : i32, i32, i32, i32
  }
}

</mosaic_0001>

<bundles_post_ra>
// kernel: tpu_custom_call.1
= control target key start
LH: loop header
LB: loop body
LE: loop exit
PB: predicated region body
PF: predicated region fallthrough
CT: control target
= control target key end

     0   :  { %s1561_s0 = inlined_call_operand.vmem [shape: f32[2,8,32], index: 0, kind: input, shape index: {}]   ;;  %s1562_s1 = inlined_call_operand.vmem [shape: f32[2,8,32], index: 1, kind: input, shape index: {}]   ;;  %s1563_s2 = inlined_call_operand.vmem [shape: f32[2,8,32], index: 2, kind: input, shape index: {}]   ;;  %s1564_s3 = inlined_call_operand.vmem [shape: f32[4,32,8], index: 3, kind: input, shape index: {}]   ;;  %s1565_s4 = inlined_call_operand.vmem [shape: f32[4,32,8], index: 4, kind: input, shape index: {}]   ;;  %s1566_s5 = inlined_call_operand.vmem [shape: f32[4,32,8], index: 5, kind: input, shape index: {}]   ;;  %s1567_s6 = inlined_call_operand.hbm [shape: f32[2,4,8,8], index: 6, kind: output, shape index: {0}]   ;;  %s1568_s7 = inlined_call_operand.hbm [shape: f32[2,4,8,8], index: 7, kind: output, shape index: {1}]   ;;  %s1569_s8 = inlined_call_operand.hbm [shape: f32[2,4,8,8], index: 8, kind: output, shape index: {2}]  }
   0x1   :  { %1575 = sst [smem:[#allocation12_spill]] %s1561_s0 }
   0x2   :  { %1576 = sst [smem:[#allocation13_spill]] %s1562_s1 }
   0x3   :  { %14 = vsyncpa [#allocation3], 0 }
   0x4   :  { %16 = vsyncpa [#allocation3 + $0x1], 0 }
   0x5   :  { %17 = vsyncpa [#allocation5], 0 }
   0x6   :  { %19 = vsyncpa [#allocation5 + $0x1], 0  ;;  %s1314_s27 = smov 0   ;;  %s1316_s28 = smov 0  }
   0x7   :  { %s1318_s29 = smov 0   ;;  %s1320_s30 = smov 0  }
   0x8   :  { %s1322_s9 = smov 0   ;;  %s1324_s10 = smov 0  }
   0x9   :  { %s1326_s11 = smov 0   ;;  %s1328_s12 = smov 0  }
   0xa LB: > { %1577 = sst [smem:[#allocation9_spill]] %s1257_s11  ;;  %s1571_s13 = sadd.s32 4294967295, %s1261_s12   ;;  %s1261_s12 = sphi %s1328_s12, %s25_s12   ;;  %s1257_s11 = sphi %s1326_s11, %s1588_s11   ;;  %s1253_s10 = sphi %s1324_s10, %s1593_s10   ;;  %s1249_s9 = sphi %s1322_s9, %s1586_s9   ;;  %s1245_s30 = sphi %s1320_s30, %s1592_s30   ;;  %s1241_s29 = sphi %s1318_s29, %s1591_s29   ;;  %s1237_s28 = sphi %s1316_s28, %s1590_s28   ;;  %s1233_s27 = sphi %s1314_s27, %s1589_s27  }
   0xb   : > { %s1570_s14 = sadd.s32 4294967294, %s1261_s12   ;;  %s34_s15 = sadd.s32 1, %s1253_s10 }
   0xc   : > { %p35_p0 = scmp.ge.s32.totalorder %s34_s15, 4  ;;  %s37_s16 = sadd.s32 1, %s1257_s11 }
   0xd   : > { %p212_p1 = scmp.ne.s32.totalorder %s1241_s29, %s1237_s28  ;;  %p213_p2 = scmp.eq.s32.totalorder %s1571_s13, 7 }
   0xe   : > { %s1595_s15 = smov (%p35_p0, %s34_s15), 0  ;;  %s1597_s16 = smov (!%p35_p0, %s37_s16), %s1257_s11 }
   0xf   : > { %1578 = sst [smem:[#allocation10_spill]] %s1595_s15  ;;  %s198_s17 = ssub.s32 %s1253_s10, %s1595_s15 }
  0x10   : > { %p1367_p3 = por %p213_p2, %p212_p1  ;;  %p39_p4 = scmp.ge.s32.totalorder %s1597_s16, 2 }
  0x11   : > { %p218_p5 = scmp.ne.s32.totalorder %s1237_s28, %s1233_s27  ;;  %p219_p6 = scmp.eq.s32.totalorder %s1570_s14, 7 }
  0x12   : > { %p927_p7 = scmp.ge.s32.totalorder %s1261_s12, 1  ;;  %s1599_s16 = smov (%p39_p4, %s1597_s16), 0 }
  0x13   : > { %1580 = sst [smem:[#allocation11_spill]] %s1599_s16  ;;  %p1378_p8 = por %p219_p6, %p218_p5 }
  0x14   : > { %p338_p9 = scmp.lt.s32.totalorder %s1261_s12, 9  ;;  %s197_s20 = ssub.s32 %s1257_s11, %s1599_s16 }
  0x15   : > { %s202_s21 = sadd.s32 1, %s1241_s29  ;;  %s199_s22 = sor.u32 %s198_s17, %s197_s20 }
  0x16   : > { %p339_p10 = pnand %p927_p7, %p338_p9  ;;  %p200_p11 = scmp.eq.s32.totalorder %s199_s22, 0 }
  0x17   : > { %p416_p12 = scmp.lt.s32.totalorder (!%p339_p10), %s1245_s30, 3  ;;  %p404_p13 = scmp.lt.s32.totalorder (!%p339_p10), %s1249_s9, 1  ;;  %v1263_v0 = vmov (!%p339_p10), 0.0|0.0   ;;  %vm1264_vm0 = vmmov (!%p339_p10), 0   ;;  %v1265_v1 = vmov (!%p339_p10), 0.0   ;;  %vm436_vm1 = vcmask (!%p339_p10), 261120  }
  0x18   : > { %s1387_s23 = scalar_select %p200_p11, %s1241_s29, %s202_s21  }
  0x19   : > { %342 = sbr.rel (%p339_p10) target bundleno = 320 (0x140), region = 44  ;;  %1005 = vmatprep.subr.bf16.mxu0 (!%p339_p10), %v1263_v0  ;;  %1011 = vmatprep.subr.bf16.mxu1 (!%p339_p10), %v1263_v0  ;;  %s1582_s0 = sld [smem:[#allocation12_spill]] (!%p339_p10)  ;;  %vm510_vm2 = vcmask (!%p339_p10), 64512  }
  0x1a   : > { %980 = vmatprep.mubr.msk.f32.mxu0 (!%p339_p10), %vm1264_vm0, %v1265_v1  ;;  %991 = vmatprep.mubr.msk.f32.mxu1 (!%p339_p10), %vm1264_vm0, %v1265_v1  ;;  %s1583_s1 = sld [smem:[#allocation13_spill]] (!%p339_p10)  ;;  %s946_s22 = sshll.u32 (!%p339_p10), %s1249_s9, 2 }
  0x1b   : > { %s692_s17 = sadd.s32 (!%p339_p10), %s1245_s30, %s946_s22 }
  0x20   : > { %s417_s24 = scalar_select %p416_p12, %s1245_s30, 3 }
  0x21   : > { %s405_s25 = scalar_select %p404_p13, %s1249_s9, 1 }
  0x22   : > { %s954_s26 = sshll.u32 %s417_s24, 5  ;;  %s1266_s9 = smov [#allocation2]  }
  0x23   : > { %s420_s21 = scalar_lea.vmem %s1564_s3, %s954_s26  ;;  %s425_s13 = scalar_lea.vmem %s1565_s4, %s954_s26 }
  0x24   : > { %v432_v2 = vld [vmem:[%s420_s21] sm:$0xff]  ;;  %v433_v3 = vld [vmem:[%s420_s21 + $0x8] sm:$0xff]  ;;  %v434_v4 = vld [vmem:[%s420_s21 + $0x10] sm:$0xff]  ;;  %s430_s11 = scalar_lea.vmem %s1566_s5, %s954_s26  ;;  %s1404_s24 = sshll.u32 %s405_s25, 3 }
  0x25   : > { %v1006_v5 = vpack.c.bf16 %v433_v3, %v432_v2  ;;  %v435_v6 = vld [vmem:[%s420_s21 + $0x18] sm:$0xff]  ;;  %v513_v7 = vld [vmem:[%s425_s13] sm:$0xff]  ;;  %v514_v8 = vld [vmem:[%s425_s13 + $0x8] sm:$0xff]  ;;  %s407_s15 = scalar_lea.vmem %s1582_s0, %s1404_s24  ;;  %s411_s26 = scalar_lea.vmem %s1583_s1, %s1404_s24 }
  0x26   : > { %v1012_v9 = vpack.c.bf16 %v514_v8, %v513_v7  ;;  %v1009_v10 = vpack.c.bf16 %v435_v6, %v434_v4  ;;  %v515_v11 = vld [vmem:[%s425_s13 + $0x10] sm:$0xff]  ;;  %v516_v12 = vld [vmem:[%s425_s13 + $0x18] sm:$0xff]  ;;  %v592_v13 = vld [vmem:[%s430_s11] sm:$0xff]  ;;  %s415_s21 = scalar_lea.vmem %s1563_s2, %s1404_s24  ;;  %s1431_s25 = sshll.u32 %s692_s17, 7 }
  0x27   : > { %1007 = vmatpush3.bf16.msra.mxu0 %v1006_v5  ;;  %v593_v14 = vld [vmem:[%s430_s11 + $0x8] sm:$0xff]  ;;  %v1015_v15 = vpack.c.bf16 %v516_v12, %v515_v11  ;;  %v431_v16 = vld [vmem:[%s407_s15] sm:$0xff]  ;;  %v594_v18 = vld [vmem:[%s430_s11 + $0x10] sm:$0xff]  ;;  %s1584_s15 = sadd.s32 4294967295, %s1261_s12   ;;  %s1439_s0 = scalar_lea.hbm %s1567_s6, %s1431_s25 }
  0x28   : > { %1008 = vmatprep.subr.bf16.mxu0 %v1263_v0  ;;  %1013 = vmatpush3.bf16.msra.mxu1 %v1012_v9  ;;  %v1018_v17 = vpack.c.bf16 %v593_v14, %v592_v13  ;;  %v595_v19 = vld [vmem:[%s430_s11 + $0x18] sm:$0xff]  ;;  %v512_v20 = vld [vmem:[%s411_s26] sm:$0xff]  ;;  %s387_s11 = sand.u32 1, %s1237_s28   ;;  %s1429_s16 = sand.u32 1, %s1584_s15  }
  0x29   : > { %1014 = vmatprep.subr.bf16.mxu1 %v1263_v0  ;;  %v1021_v21 = vpack.c.bf16 %v595_v19, %v594_v18  ;;  %v591_v22 = vld [vmem:[%s415_s21] sm:$0xff]  ;;  %s1424_s14 = sshll.u32 %s387_s11, 3  ;;  %s1447_s17 = scalar_lea.hbm %s1568_s7, %s1431_s25 }
  0x2a   : > { %s389_s26 = scalar_lea.vmem [#allocation2], %s1424_s14  ;;  %s396_s13 = scalar_lea.vmem [#allocation4], %s1424_s14 }
  0x2b   : > { %1010 = vmatpush3.bf16.msra.mxu0 %v1009_v10  ;;  %s696_s24 = sshll.u32 %s389_s26, 4  ;;  %s711_s20 = sshll.u32 %s396_s13, 4  ;;  %s1441_s24 = int_to_ptr.vmem [resolvable:$true] %s696_s24  ;;  %s1449_s20 = int_to_ptr.vmem [resolvable:$true] %s711_s20 }
  0x2c   : > { %1017 = vmatprep.subr.bf16.mxu0 %v1263_v0  ;;  %1016 = vmatpush3.bf16.msra.mxu1 %v1015_v15  ;;  %s671_s15 = scalar_lea.sflag [#allocation3], %s387_s11  ;;  %s1107_s21 = scalar_lea.vmem %s1441_s24, 128 }
  0x2d   : > { %p1108_p0 = scmp.ne.s32.totalorder %s1441_s24, %s1107_s21  ;;  %s1111_s30 = sshll.u32 %s1266_s9, 4  ;;  %s1112_s30 = int_to_ptr.vmem [resolvable:$false] %s1111_s30 }
  0x2e   : > { %981 = vmatmul.mubr.msk.f32.vlgmr.msra.gmra.mrb[0].mxu0 %vm436_vm1, %v431_v16  ;;  %s1113_s22 = scalar_lea.vmem %s1112_s30, 256  ;;  %p1114_p4 = scmp.lt.s32.totalorder %s1441_s24, %s1112_s30 }
  0x2f   : > { %1019 = vmatpush3.bf16.msra.mxu0 %v1018_v17  ;;  %992 = vmatmul.mubr.msk.f32.vlgmr.msra.gmra.mrb[0].mxu1 %vm436_vm1, %v512_v20  ;;  %p1109_p1 = pnand %p1108_p0, %p1367_p3  ;;  %p1115_p5 = scmp.lt.s32.totalorder %s1113_s22, %s1107_s21 }
  0x30   : > { %1020 = vmatprep.subr.bf16.mxu0 %v1263_v0  ;;  %1002 = vmatprep.mubr.msk.f32.mxu0 %vm1264_vm0, %v1265_v1 }
  0x31   : > { %p1110_p2 = pneg %p1109_p1  ;;  %p1116_p6 = por %p1115_p5, %p1114_p4 }
  0x33   : > { %1022 = vmatpush3.bf16.msra.mxu0 %v1021_v21  ;;  %p1117_p7 = pnand %p1116_p6, %p1110_p2 }
  0x36   : > { %1003 = vmatmul.mubr.msk.f32.vlgmr.msra.gmra.mrb[2].mxu0 %vm436_vm1, %v591_v22 }
 0x101   : > { %v506_v23 = vpop.f32.mrb[0].mxu0 }
 0x102   : > { %511 = vst.msk [vmem:[%s389_s26] sm:$0xff] %vm510_vm2, %v506_v23  ;;  %v982_v24 = vpop.f32.mrb[1].mxu0  ;;  %v586_v25 = vpop.f32.mrb[0].mxu1 }
 0x103   : > { %590 = vst.msk [vmem:[%s396_s13] sm:$0xff] %vm510_vm2, %v586_v25  ;;  %v993_v26 = vpop.f32.mrb[1].mxu1 }
 0x104   : > { %1120 = shalt.err (!%p1117_p7)
}
 0x105   : > { %s1121_s11 = scalar_lea.hbm %s1439_s0, 128  ;;  %s1125_s9 = scalar_lea.hbm %s1567_s6, 1024 }
 0x106   : > { %p1122_p9 = scmp.ne.s32.totalorder %s1439_s0, %s1121_s11  ;;  %p1126_p12 = scmp.lt.u32.totalorder %s1439_s0, %s1567_s6 }
 0x107   : > { %p1127_p13 = scmp.lt.u32.totalorder %s1125_s9, %s1121_s11  ;;  %p1129_p1 = scmp.lt.u32.totalorder %s1121_s11, %s1439_s0 }
 0x108   : > { %p1123_p10 = pnand %p1122_p9, %p1367_p3 }
 0x109   : > { %p1128_p0 = por %p1127_p13, %p1126_p12 }
 0x10a   : > { %p1124_p11 = pneg %p1123_p10 }
 0x10b   : > { %p1130_p2 = por %p1129_p1, %p1128_p0 }
 0x10d   : > { %p1131_p4 = pnand %p1130_p2, %p1124_p11 }
 0x10f   : > { %1134 = shalt.err (!%p1131_p4)
}
 0x110   : > { %1023 = dma.vmem_to_hbm [thread:$0]  (%p1367_p3), %s1441_s24, 128, %s1439_s0, %s671_s15  }
 0x111   : > { %s676_s21 = scalar_lea.sflag [#allocation5], %s1429_s16  ;;  %s1135_s22 = scalar_lea.vmem %s1449_s20, 128 }
 0x112   : > { %p1136_p5 = scmp.ne.s32.totalorder %s1449_s20, %s1135_s22  ;;  %s1267_s1 = smov [#allocation4]  }
 0x113   : > { %s1139_s11 = sshll.u32 %s1267_s1, 4  ;;  %s1140_s11 = int_to_ptr.vmem [resolvable:$false] %s1139_s11 }
 0x114   : > { %p1137_p6 = pnand %p1136_p5, %p1367_p3  ;;  %s1141_s26 = scalar_lea.vmem %s1140_s11, 256 }
 0x115   : > { %p1142_p9 = scmp.lt.s32.totalorder %s1449_s20, %s1140_s11  ;;  %p1143_p10 = scmp.lt.s32.totalorder %s1141_s26, %s1135_s22 }
 0x116   : > { %p1138_p7 = pneg %p1137_p6 }
 0x117   : > { %p1144_p11 = por %p1143_p10, %p1142_p9 }
 0x119   : > { %p1145_p12 = pnand %p1144_p11, %p1138_p7 }
 0x11b   : > { %1148 = shalt.err (!%p1145_p12)
}
 0x11c   : > { %s1149_s0 = scalar_lea.hbm %s1447_s17, 128  ;;  %s1153_s13 = scalar_lea.hbm %s1568_s7, 1024 }
 0x11d   : > { %p1150_p13 = scmp.ne.s32.totalorder %s1447_s17, %s1149_s0  ;;  %p1154_p2 = scmp.lt.u32.totalorder %s1447_s17, %s1568_s7 }
 0x11e   : > { %p1155_p4 = scmp.lt.u32.totalorder %s1153_s13, %s1149_s0  ;;  %p1157_p6 = scmp.lt.u32.totalorder %s1149_s0, %s1447_s17 }
 0x11f   : > { %p1151_p0 = pnand %p1150_p13, %p1367_p3 }
 0x120   : > { %p1156_p5 = por %p1155_p4, %p1154_p2 }
 0x121   : > { %p1152_p1 = pneg %p1151_p0 }
 0x122   : > { %p1158_p7 = por %p1157_p6, %p1156_p5 }
 0x124   : > { %p1159_p9 = pnand %p1158_p7, %p1152_p1 }
 0x126   : > { %1162 = shalt.err (!%p1159_p9)
}
 0x127   : > { %1024 = dma.vmem_to_hbm [thread:$0]  (%p1367_p3), %s1449_s20, 128, %s1447_s17, %s676_s21   ;;  %v665_v27 = vpop.f32.mrb[2].mxu0 }
 0x128   : > { %s403_s22 = scalar_lea.vmem [#allocation6], %s1424_s14  ;;  %s1505_s0 = scalar_lea.hbm %s1569_s8, %s1431_s25  ;;  %v1004_v28 = vpop.f32.mrb[3].mxu0 }
 0x129   : > { %s726_s1 = sshll.u32 %s403_s22, 4  ;;  %669 = vst.msk [vmem:[%s403_s22] sm:$0xff] %vm510_vm2, %v665_v27  ;;  %s1268_s14 = smov [#allocation6]   ;;  %s1499_s1 = int_to_ptr.vmem [resolvable:$true] %s726_s1 }
 0x12a   : > { %s1163_s24 = scalar_lea.vmem %s1499_s1, 128  ;;  %s1167_s20 = sshll.u32 %s1268_s14, 4  ;;  %s1168_s20 = int_to_ptr.vmem [resolvable:$false] %s1167_s20 }
 0x12b   : > { %p1164_p10 = scmp.ne.s32.totalorder %s1499_s1, %s1163_s24  ;;  %s1169_s17 = scalar_lea.vmem %s1168_s20, 256 }
 0x12c   : > { %p1170_p13 = scmp.lt.s32.totalorder %s1499_s1, %s1168_s20  ;;  %p1171_p0 = scmp.lt.s32.totalorder %s1169_s17, %s1163_s24 }
 0x12d   : > { %p1165_p11 = pnand %p1164_p10, %p1367_p3 }
 0x12e   : > { %p1172_p1 = por %p1171_p0, %p1170_p13 }
 0x12f   : > { %p1166_p12 = pneg %p1165_p11 }
 0x131   : > { %p1173_p2 = pnand %p1172_p1, %p1166_p12 }
 0x133   : > { %1176 = shalt.err (!%p1173_p2)
}
 0x134   : > { %s1177_s25 = scalar_lea.hbm %s1505_s0, 128  ;;  %s1181_s9 = scalar_lea.hbm %s1569_s8, 1024 }
 0x135   : > { %p1178_p4 = scmp.ne.s32.totalorder %s1505_s0, %s1177_s25  ;;  %p1182_p7 = scmp.lt.u32.totalorder %s1505_s0, %s1569_s8 }
 0x136   : > { %p1183_p9 = scmp.lt.u32.totalorder %s1181_s9, %s1177_s25  ;;  %p1185_p11 = scmp.lt.u32.totalorder %s1177_s25, %s1505_s0 }
 0x137   : > { %p1179_p5 = pnand %p1178_p4, %p1367_p3 }
 0x138   : > { %p1184_p10 = por %p1183_p9, %p1182_p7 }
 0x139   : > { %p1180_p6 = pneg %p1179_p5 }
 0x13a   : > { %p1186_p12 = por %p1185_p11, %p1184_p10 }
 0x13c   : > { %p1187_p13 = pnand %p1186_p12, %p1180_p6 }
 0x13e   : > { %1190 = shalt.err (!%p1187_p13)
}
 0x13f   : > { %1025 = dma.vmem_to_hbm [thread:$0]  (%p1367_p3), %s1499_s1, 128, %s1505_s0, %s676_s21  }
 0x140 PF: > { %p1039_p0 = scmp.ge.s32.totalorder %s1261_s12, 2  ;;  %s738_s11 = sand.u32 1, %s1233_s27  }
 0x141   : > { %s739_s26 = scalar_lea.sflag [#allocation3], %s738_s11 }
 0x142   : > { %p1030_p1 = pnand %p1039_p0, %p1378_p8 }
 0x144   : > { %1224 = dma.done.wait (!%p1030_p1), %s739_s26, 128  }
 0x145   : > { %1226 = vsyncadd (!%p1030_p1), %s739_s26, 4294967168  ;;  %s1585_s24 = sadd.s32 4294967294, %s1261_s12  }
 0x146   : > { %s747_s14 = sand.u32 1, %s1585_s24  }
 0x147   : > { %s748_s18 = scalar_lea.sflag [#allocation5], %s747_s14 }
 0x148   : > { %1228 = dma.done.wait (!%p1030_p1), %s748_s18, 256  }
 0x149   : > { %1230 = vsyncadd (!%p1030_p1), %s748_s18, 4294967040  ;;  %s25_s12 = sadd.s32 1, %s1261_s12   ;;  %s1586_s9 = sld [smem:[#allocation9_spill]] }
 0x14a   : > { %p22_p3 = scmp.ge.s32.totalorder %s25_s12, 10   ;;  %s1587_s16 = sld [smem:[#allocation10_spill]] }
 0x14b   : > { %s1588_s11 = sld [smem:[#allocation11_spill]]  ;;  %s1589_s27 = smov %s1237_s28 }
 0x14c   : > { %s1590_s28 = smov %s1241_s29  ;;  %s1591_s29 = smov %s1387_s23 }
 0x14d   : > { %s1592_s30 = smov %s1253_s10  ;;  %24 = sbr.rel (!%p22_p3) target bundleno = 10 (0xa), region = 126 }
 0x150   : > { %s1593_s10 = smov %s1587_s16 }
 0x154   :  { %762 = vsyncpa [#allocation3], 1 }
 0x155   :  { %764 = vsyncpa [#allocation3 + $0x1], 1 }
 0x156   :  { %765 = vsyncpa [#allocation5], 1 }
 0x157   :  { %767 = vsyncpa [#allocation5 + $0x1], 1 }

</bundles_post_ra>
